<compile_context>
chip_gen: v7x
topology: tpu7x:2x2x1
jax: 0.10.0
libtpu: 0.0.40
codegen_flags: <defaults>
</compile_context>

<pallas_src>
import jax
import jax.numpy as jnp
from jax.experimental import pallas as pl
from jax.experimental.pallas import tpu as pltpu


def _output_unit_kernel(q_ref, mem_ref, wqp_ref, bqp_ref, w1m_ref, w1q_ref,
                        b1_ref, w2_ref, b2_ref, out_ref):
    # Question projection: q = q_emb @ Wqp^T + bqp   (bf16 operands, f32 acc).
    q = jnp.dot(q_ref[...], wqp_ref[...], preferred_element_type=jnp.float32)
    q = q + bqp_ref[...]

    # Classifier layer 1 with the concat folded into two matmuls:
    #   h = memory @ W1[:D] + q @ W1[D:] + b1
    h = jnp.dot(mem_ref[...], w1m_ref[...], preferred_element_type=jnp.float32)
    h = h + jnp.dot(q.astype(w1q_ref.dtype), w1q_ref[...],
                    preferred_element_type=jnp.float32)
    h = h + b1_ref[...]

    # ELU (alpha = 1): x if x > 0 else exp(x) - 1   (f32, EUP exp).
    h = jnp.where(h > 0, h, jnp.exp(h) - 1.0)

    # Classifier layer 2 (output lanes pre-padded to a multiple of 128).
    out = jnp.dot(h.astype(w2_ref.dtype), w2_ref[...],
                  preferred_element_type=jnp.float32)
    out_ref[...] = (out + b2_ref[...]).astype(out_ref.dtype)


def output_unit_forward(question_embedding, memory, w_qproj, b_qproj,
                        w_cls1, b_cls1, w_cls2, b_cls2, *, block_b=None,
                        compute_dtype=jnp.bfloat16):
    """Pallas implementation of OutputUnit.forward (inference).

    question_embedding: (B, D) f32
    memory:             (B, D) f32
    w_qproj, b_qproj:   (D, D), (D,)        -- nn.Linear(D, D) params
    w_cls1,  b_cls1:    (D, 2D), (D,)       -- nn.Linear(2D, D) params
    w_cls2,  b_cls2:    (NA, D), (NA,)      -- nn.Linear(D, NA) params
    returns:            (B, NA) f32
    """
    B, D = question_embedding.shape
    assert memory.shape == (B, D)
    NA = w_cls2.shape[0]
    assert w_qproj.shape == (D, D) and b_qproj.shape == (D,)
    assert w_cls1.shape == (D, 2 * D) and b_cls1.shape == (D,)
    assert w_cls2.shape == (NA, D) and b_cls2.shape == (NA,)

    # Pre-transpose weights to (in, out), split the concat weight into its
    # memory / question halves, pad the output dim to a lane-dense 128-multiple.
    na_pad = ((NA + 127) // 128) * 128
    wqp_t = w_qproj.T.astype(compute_dtype)                           # (D, D)
    w1_t = w_cls1.T                                                   # (2D, D)
    w1_mem = w1_t[:D].astype(compute_dtype)                           # (D, D)
    w1_q = w1_t[D:].astype(compute_dtype)                             # (D, D)
    w2_t = jnp.zeros((D, na_pad), w_cls2.dtype).at[:, :NA].set(w_cls2.T)
    w2_t = w2_t.astype(compute_dtype)                                 # (D, na_pad)

    bqp = b_qproj.reshape(1, D).astype(jnp.float32)
    b1 = b_cls1.reshape(1, D).astype(jnp.float32)
    b2 = jnp.zeros((1, na_pad), jnp.float32).at[:, :NA].set(
        b_cls2.astype(jnp.float32))

    q_in = question_embedding.astype(compute_dtype)
    m_in = memory.astype(compute_dtype)

    # Batch tile: biggest of these that divides B (sublane aligned, sized well
    # under v7x's 32 MiB default scoped VMEM), else the whole batch.
    if block_b is None:
        block_b = B
        for tb in (512, 256, 128, 64, 32, 16, 8):
            if B % tb == 0:
                block_b = tb
                break
    grid = (B // block_b,)

    row_spec = pl.BlockSpec((block_b, D), lambda i: (i, 0))

    def resident(shape):
        # Same block index for every grid step -> stays resident in VMEM.
        return pl.BlockSpec(shape, lambda i: (0, 0))

    out_padded = pl.pallas_call(
        _output_unit_kernel,
        out_shape=jax.ShapeDtypeStruct((B, na_pad), jnp.float32),
        grid=grid,
        in_specs=[
            row_spec,                # question_embedding tile (streamed)
            row_spec,                # memory tile             (streamed)
            resident((D, D)),        # Wqp^T
            resident((1, D)),        # bqp
            resident((D, D)),        # W1 half acting on memory
            resident((D, D)),        # W1 half acting on projected question
            resident((1, D)),        # b1
            resident((D, na_pad)),   # W2^T (lane-padded)
            resident((1, na_pad)),   # b2   (lane-padded)
        ],
        out_specs=pl.BlockSpec((block_b, na_pad), lambda i: (i, 0)),
        compiler_params=pltpu.CompilerParams(
            dimension_semantics=("parallel",)),
    )(q_in, m_in, wqp_t, bqp, w1_mem, w1_q, b1, w2_t, b2)

    return out_padded[:, :NA]


def _reference(question_embedding, memory, w_qproj, b_qproj,
               w_cls1, b_cls1, w_cls2, b_cls2, compute_dtype=jnp.bfloat16):
    # Same math as the kernel (bf16 operands, f32 accumulation) so the
    # comparison isolates kernel mechanics from bf16 quantization.
    f32 = jnp.float32
    q = jnp.dot(question_embedding.astype(compute_dtype),
                w_qproj.T.astype(compute_dtype),
                preferred_element_type=f32) + b_qproj.astype(f32)
    x = jnp.concatenate(
        [memory.astype(compute_dtype), q.astype(compute_dtype)], axis=-1)
    h = jnp.dot(x, w_cls1.T.astype(compute_dtype),
                preferred_element_type=f32) + b_cls1.astype(f32)
    h = jnp.where(h > 0, h, jnp.exp(h) - 1.0)
    out = jnp.dot(h.astype(compute_dtype), w_cls2.T.astype(compute_dtype),
                  preferred_element_type=f32) + b_cls2.astype(f32)
    return out


if __name__ == "__main__":
    key = jax.random.PRNGKey(0)
    keys = jax.random.split(key, 8)

    batch = 32
    module_dim = 128      # small, lane-aligned stand-in for the default 512
    num_answers = 28

    q_emb = jax.random.normal(keys[0], (batch, module_dim), dtype=jnp.float32)
    memory = jax.random.normal(keys[1], (batch, module_dim), dtype=jnp.float32)

    def linear_params(kw, kb, fan_out, fan_in):
        # PyTorch nn.Linear default init: uniform(-1/sqrt(fan_in), 1/sqrt(fan_in)).
        bound = 1.0 / (fan_in ** 0.5)
        w = jax.random.uniform(kw, (fan_out, fan_in), jnp.float32, -bound, bound)
        b = jax.random.uniform(kb, (fan_out,), jnp.float32, -bound, bound)
        return w, b

    w_qproj, b_qproj = linear_params(keys[2], keys[3], module_dim, module_dim)
    w_cls1, b_cls1 = linear_params(keys[4], keys[5], module_dim, 2 * module_dim)
    w_cls2, b_cls2 = linear_params(keys[6], keys[7], num_answers, module_dim)

    out = output_unit_forward(q_emb, memory, w_qproj, b_qproj,
                              w_cls1, b_cls1, w_cls2, b_cls2)
    out = jax.block_until_ready(out)

    ref = _reference(q_emb, memory, w_qproj, b_qproj,
                     w_cls1, b_cls1, w_cls2, b_cls2)
    assert out.shape == (batch, num_answers)
    assert jnp.allclose(out, ref, atol=2e-3, rtol=2e-3), (
        "mismatch vs reference: max abs diff = %g"
        % float(jnp.max(jnp.abs(out - ref))))

    print("KERNEL_OK")
</pallas_src>

<mosaic_0001>
module attributes {stable_mosaic.version = 11 : i64} {
  func.func @_output_unit_kernel(%arg0: i32, %arg1: memref<32x128xbf16, #tpu.memory_space<vmem>>, %arg2: memref<32x128xbf16, #tpu.memory_space<vmem>>, %arg3: memref<128x128xbf16, #tpu.memory_space<vmem>>, %arg4: memref<1x128xf32, #tpu.memory_space<vmem>>, %arg5: memref<128x128xbf16, #tpu.memory_space<vmem>>, %arg6: memref<128x128xbf16, #tpu.memory_space<vmem>>, %arg7: memref<1x128xf32, #tpu.memory_space<vmem>>, %arg8: memref<128x128xbf16, #tpu.memory_space<vmem>>, %arg9: memref<1x128xf32, #tpu.memory_space<vmem>>, %arg10: memref<32x128xf32, #tpu.memory_space<vmem>>) attributes {dimension_semantics = [#tpu.dimension_semantics<parallel>], iteration_bounds = array<i64: 1>, scalar_prefetch = 0 : i64, scratch_operands = 0 : i64, tpu.core_type = #tpu.core_type<tc>, window_params = [{transform_indices = @transform_0, window_bounds = array<i64: 32, 128>}, {transform_indices = @transform_1, window_bounds = array<i64: 32, 128>}, {pipeline_mode = #tpu.pipeline_mode<synchronous>, transform_indices = @transform_2, window_bounds = array<i64: 128, 128>}, {pipeline_mode = #tpu.pipeline_mode<synchronous>, transform_indices = @transform_3, window_bounds = array<i64: 1, 128>}, {pipeline_mode = #tpu.pipeline_mode<synchronous>, transform_indices = @transform_4, window_bounds = array<i64: 128, 128>}, {pipeline_mode = #tpu.pipeline_mode<synchronous>, transform_indices = @transform_5, window_bounds = array<i64: 128, 128>}, {pipeline_mode = #tpu.pipeline_mode<synchronous>, transform_indices = @transform_6, window_bounds = array<i64: 1, 128>}, {pipeline_mode = #tpu.pipeline_mode<synchronous>, transform_indices = @transform_7, window_bounds = array<i64: 128, 128>}, {pipeline_mode = #tpu.pipeline_mode<synchronous>, transform_indices = @transform_8, window_bounds = array<i64: 1, 128>}, {transform_indices = @transform_9, window_bounds = array<i64: 32, 128>}]} {
    %c0 = arith.constant 0 : index
    %c0_0 = arith.constant 0 : index
    %0 = vector.load %arg1[%c0, %c0_0] : memref<32x128xbf16, #tpu.memory_space<vmem>>, vector<32x128xbf16>
    %c0_1 = arith.constant 0 : index
    %c0_2 = arith.constant 0 : index
    %1 = vector.load %arg3[%c0_1, %c0_2] : memref<128x128xbf16, #tpu.memory_space<vmem>>, vector<128x128xbf16>
    %cst = arith.constant dense<0.000000e+00> : vector<32x128xf32>
    %2 = tpu.matmul %0, %1, %cst {dimension_numbers = #tpu.dot_dimension_numbers<[1], [0], [0], [1], [0, 0, 1, 1], [], []>} : vector<32x128xbf16>, vector<128x128xbf16>, vector<32x128xf32> -> vector<32x128xf32>
    %c0_3 = arith.constant 0 : index
    %c0_4 = arith.constant 0 : index
    %3 = vector.load %arg4[%c0_3, %c0_4] : memref<1x128xf32, #tpu.memory_space<vmem>>, vector<1x128xf32>
    %4 = vector.broadcast %3 : vector<1x128xf32> to vector<32x128xf32>
    %5 = arith.addf %2, %4 : vector<32x128xf32>
    %c0_5 = arith.constant 0 : index
    %c0_6 = arith.constant 0 : index
    %6 = vector.load %arg2[%c0_5, %c0_6] : memref<32x128xbf16, #tpu.memory_space<vmem>>, vector<32x128xbf16>
    %c0_7 = arith.constant 0 : index
    %c0_8 = arith.constant 0 : index
    %7 = vector.load %arg5[%c0_7, %c0_8] : memref<128x128xbf16, #tpu.memory_space<vmem>>, vector<128x128xbf16>
    %cst_9 = arith.constant dense<0.000000e+00> : vector<32x128xf32>
    %8 = tpu.matmul %6, %7, %cst_9 {dimension_numbers = #tpu.dot_dimension_numbers<[1], [0], [0], [1], [0, 0, 1, 1], [], []>} : vector<32x128xbf16>, vector<128x128xbf16>, vector<32x128xf32> -> vector<32x128xf32>
    %9 = arith.truncf %5 : vector<32x128xf32> to vector<32x128xbf16>
    %c0_10 = arith.constant 0 : index
    %c0_11 = arith.constant 0 : index
    %10 = vector.load %arg6[%c0_10, %c0_11] : memref<128x128xbf16, #tpu.memory_space<vmem>>, vector<128x128xbf16>
    %cst_12 = arith.constant dense<0.000000e+00> : vector<32x128xf32>
    %11 = tpu.matmul %9, %10, %cst_12 {dimension_numbers = #tpu.dot_dimension_numbers<[1], [0], [0], [1], [0, 0, 1, 1], [], []>} : vector<32x128xbf16>, vector<128x128xbf16>, vector<32x128xf32> -> vector<32x128xf32>
    %12 = arith.addf %8, %11 : vector<32x128xf32>
    %c0_13 = arith.constant 0 : index
    %c0_14 = arith.constant 0 : index
    %13 = vector.load %arg7[%c0_13, %c0_14] : memref<1x128xf32, #tpu.memory_space<vmem>>, vector<1x128xf32>
    %14 = vector.broadcast %13 : vector<1x128xf32> to vector<32x128xf32>
    %15 = arith.addf %12, %14 : vector<32x128xf32>
    %cst_15 = arith.constant 0.000000e+00 : f32
    %16 = vector.broadcast %cst_15 : f32 to vector<32x128xf32>
    %17 = arith.cmpf ogt, %15, %16 : vector<32x128xf32>
    %18 = math.exp %15 : vector<32x128xf32>
    %cst_16 = arith.constant 1.000000e+00 : f32
    %19 = vector.broadcast %cst_16 : f32 to vector<32x128xf32>
    %20 = arith.subf %18, %19 : vector<32x128xf32>
    %21 = arith.select %17, %15, %20 : vector<32x128xi1>, vector<32x128xf32>
    %22 = arith.truncf %21 : vector<32x128xf32> to vector<32x128xbf16>
    %c0_17 = arith.constant 0 : index
    %c0_18 = arith.constant 0 : index
    %23 = vector.load %arg8[%c0_17, %c0_18] : memref<128x128xbf16, #tpu.memory_space<vmem>>, vector<128x128xbf16>
    %cst_19 = arith.constant dense<0.000000e+00> : vector<32x128xf32>
    %24 = tpu.matmul %22, %23, %cst_19 {dimension_numbers = #tpu.dot_dimension_numbers<[1], [0], [0], [1], [0, 0, 1, 1], [], []>} : vector<32x128xbf16>, vector<128x128xbf16>, vector<32x128xf32> -> vector<32x128xf32>
    %c0_20 = arith.constant 0 : index
    %c0_21 = arith.constant 0 : index
    %25 = vector.load %arg9[%c0_20, %c0_21] : memref<1x128xf32, #tpu.memory_space<vmem>>, vector<1x128xf32>
    %26 = vector.broadcast %25 : vector<1x128xf32> to vector<32x128xf32>
    %27 = arith.addf %24, %26 : vector<32x128xf32>
    %c0_22 = arith.constant 0 : index
    %c0_23 = arith.constant 0 : index
    %28 = vector.load %arg10[%c0_22, %c0_23] : memref<32x128xf32, #tpu.memory_space<vmem>>, vector<32x128xf32>
    tpu.vector_store %arg10[%c0_22, %c0_23], %27 {strides = array<i32>} : memref<32x128xf32, #tpu.memory_space<vmem>>, vector<32x128xf32>,
    return
  }
  func.func @transform_0(%arg0: i32) -> (i32, i32) {
    %c0_i32 = arith.constant 0 : i32
    %c0_i32_0 = arith.constant 0 : i32
    return %arg0, %c0_i32 : i32, i32
  }
  func.func @transform_1(%arg0: i32) -> (i32, i32) {
    %c0_i32 = arith.constant 0 : i32
    %c0_i32_0 = arith.constant 0 : i32
    return %arg0, %c0_i32 : i32, i32
  }
  func.func @transform_2(%arg0: i32) -> (i32, i32) {
    %c0_i32 = arith.constant 0 : i32
    %c0_i32_0 = arith.constant 0 : i32
    %c0_i32_1 = arith.constant 0 : i32
    return %c0_i32, %c0_i32_0 : i32, i32
  }
  func.func @transform_3(%arg0: i32) -> (i32, i32) {
    %c0_i32 = arith.constant 0 : i32
    %c0_i32_0 = arith.constant 0 : i32
    %c0_i32_1 = arith.constant 0 : i32
    return %c0_i32, %c0_i32_0 : i32, i32
  }
  func.func @transform_4(%arg0: i32) -> (i32, i32) {
    %c0_i32 = arith.constant 0 : i32
    %c0_i32_0 = arith.constant 0 : i32
    %c0_i32_1 = arith.constant 0 : i32
    return %c0_i32, %c0_i32_0 : i32, i32
  }
  func.func @transform_5(%arg0: i32) -> (i32, i32) {
    %c0_i32 = arith.constant 0 : i32
    %c0_i32_0 = arith.constant 0 : i32
    %c0_i32_1 = arith.constant 0 : i32
    return %c0_i32, %c0_i32_0 : i32, i32
  }
  func.func @transform_6(%arg0: i32) -> (i32, i32) {
    %c0_i32 = arith.constant 0 : i32
    %c0_i32_0 = arith.constant 0 : i32
    %c0_i32_1 = arith.constant 0 : i32
    return %c0_i32, %c0_i32_0 : i32, i32
  }
  func.func @transform_7(%arg0: i32) -> (i32, i32) {
    %c0_i32 = arith.constant 0 : i32
    %c0_i32_0 = arith.constant 0 : i32
    %c0_i32_1 = arith.constant 0 : i32
    return %c0_i32, %c0_i32_0 : i32, i32
  }
  func.func @transform_8(%arg0: i32) -> (i32, i32) {
    %c0_i32 = arith.constant 0 : i32
    %c0_i32_0 = arith.constant 0 : i32
    %c0_i32_1 = arith.constant 0 : i32
    return %c0_i32, %c0_i32_0 : i32, i32
  }
  func.func @transform_9(%arg0: i32) -> (i32, i32) {
    %c0_i32 = arith.constant 0 : i32
    %c0_i32_0 = arith.constant 0 : i32
    return %arg0, %c0_i32 : i32, i32
  }
}

</mosaic_0001>

<bundles_post_ra>
// kernel: tpu_custom_call.1
= control target key start
LH: loop header
LB: loop body
LE: loop exit
PB: predicated region body
PF: predicated region fallthrough
CT: control target
= control target key end

     0   :  { %14 = vsyncpa [#allocation3], 0  ;;  %s1252_s0 = inlined_call_operand.hbm [shape: bf16[32,128], index: 0, kind: input, shape index: {}]   ;;  %s1253_s1 = inlined_call_operand.hbm [shape: bf16[32,128], index: 1, kind: input, shape index: {}]   ;;  %s1254_s2 = inlined_call_operand.hbm [shape: bf16[128,128], index: 2, kind: input, shape index: {}]   ;;  %s1255_s3 = inlined_call_operand.vmem [shape: f32[1,128], index: 3, kind: input, shape index: {}]   ;;  %s1256_s4 = inlined_call_operand.hbm [shape: bf16[128,128], index: 4, kind: input, shape index: {}]   ;;  %s1257_s5 = inlined_call_operand.hbm [shape: bf16[128,128], index: 5, kind: input, shape index: {}]   ;;  %s1258_s6 = inlined_call_operand.vmem [shape: f32[1,128], index: 6, kind: input, shape index: {}]   ;;  %s1259_s7 = inlined_call_operand.hbm [shape: bf16[128,128], index: 7, kind: input, shape index: {}]   ;;  %s1260_s8 = inlined_call_operand.vmem [shape: f32[1,128], index: 8, kind: input, shape index: {}]   ;;  %s1261_s9 = inlined_call_operand.hbm [shape: f32[32,128], index: 9, kind: output, shape index: {}]  }
   0x1   :  { %15 = vsyncpa [#allocation6], 0 }
   0x2   :  { %16 = vsyncpa [#allocation9], 0 }
   0x3   :  { %17 = vsyncpa [#allocation12], 0 }
   0x4   :  { %18 = vsyncpa [#allocation4], 0  ;;  %s1059_s30 = smov [#allocation5]   ;;  %s1060_s11 = smov [#allocation8]  }
   0x5   :  { %s36_s10 = sshll.u32 %s1059_s30, 4  ;;  %s62_s12 = sshll.u32 %s1060_s11, 4  ;;  %s37_s10 = int_to_ptr.vmem [resolvable:$true] %s36_s10  ;;  %s1120_s12 = int_to_ptr.vmem [resolvable:$true] %s62_s12 }
   0x6   :  { %s895_s15 = scalar_lea.hbm %s1253_s1, 256 }
   0x7   :  { %p896_p0 = scmp.ne.s32.totalorder %s1253_s1, %s895_s15  ;;  %p899_p1 = scmp.lt.u32.totalorder %s895_s15, %s1253_s1 }
   0x9   :  { %p901_p2 = pnand %p899_p1, %p896_p0 }
   0xb   :  { %904 = shalt.err (!%p901_p2)
}
   0xc   :  { %s905_s20 = scalar_lea.vmem %s37_s10, 256  ;;  %p910_p4 = scmp.lt.s32.totalorder %s37_s10, %s37_s10 }
   0xd   :  { %p906_p3 = scmp.ne.s32.totalorder %s37_s10, %s905_s20  ;;  %p911_p5 = scmp.lt.s32.totalorder %s905_s20, %s905_s20 }
   0xf   :  { %p912_p6 = por %p911_p5, %p910_p4 }
  0x11   :  { %p913_p7 = pnand %p912_p6, %p906_p3 }
  0x13   :  { %916 = shalt.err (!%p913_p7)
}
  0x14   :  { %s1061_s21 = smov 64   ;;  %s1062_s22 = smov 4  }
  0x15   :  { %42 = dma.hbm_to_vmem [thread:$0]  %s1253_s1, 256, %s37_s10, [#allocation6], %s1061_s21, %s1061_s21, %s1062_s22  }
  0x16   :  { %s917_s27 = scalar_lea.hbm %s1256_s4, 1024 }
  0x17   :  { %p918_p8 = scmp.ne.s32.totalorder %s1256_s4, %s917_s27  ;;  %p921_p9 = scmp.lt.u32.totalorder %s917_s27, %s1256_s4 }
  0x19   :  { %p923_p10 = pnand %p921_p9, %p918_p8 }
  0x1b   :  { %926 = shalt.err (!%p923_p10)
}
  0x1c   :  { %s927_s13 = scalar_lea.vmem %s1120_s12, 1024  ;;  %p932_p12 = scmp.lt.s32.totalorder %s1120_s12, %s1120_s12 }
  0x1d   :  { %p928_p11 = scmp.ne.s32.totalorder %s1120_s12, %s927_s13  ;;  %p933_p13 = scmp.lt.s32.totalorder %s927_s13, %s927_s13 }
  0x1f   :  { %p934_p0 = por %p933_p13, %p932_p12 }
  0x21   :  { %p935_p1 = pnand %p934_p0, %p928_p11 }
  0x23   :  { %938 = shalt.err (!%p935_p1)
}
  0x24   :  { %68 = dma.hbm_to_vmem [thread:$0]  %s1256_s4, 1024, %s1120_s12, [#allocation9], %s1061_s21, %s1061_s21, %s1062_s22  }
  0x25   :  { %s1063_s14 = smov [#allocation2]   ;;  %s1064_s16 = smov [#allocation7]  }
  0x26   :  { %s24_s15 = sshll.u32 %s1063_s14, 4  ;;  %s48_s17 = sshll.u32 %s1064_s16, 4  ;;  %s25_s15 = int_to_ptr.vmem [resolvable:$true] %s24_s15  ;;  %s1157_s17 = int_to_ptr.vmem [resolvable:$true] %s48_s17 }
  0x27   :  { %s939_s20 = scalar_lea.hbm %s1252_s0, 256 }
  0x28   :  { %p940_p2 = scmp.ne.s32.totalorder %s1252_s0, %s939_s20  ;;  %p943_p3 = scmp.lt.u32.totalorder %s939_s20, %s1252_s0 }
  0x2a   :  { %p945_p4 = pnand %p943_p3, %p940_p2 }
  0x2c   :  { %948 = shalt.err (!%p945_p4)
}
  0x2d   :  { %s949_s4 = scalar_lea.vmem %s25_s15, 256  ;;  %p954_p6 = scmp.lt.s32.totalorder %s25_s15, %s25_s15 }
  0x2e   :  { %p950_p5 = scmp.ne.s32.totalorder %s25_s15, %s949_s4  ;;  %p955_p7 = scmp.lt.s32.totalorder %s949_s4, %s949_s4 }
  0x30   :  { %p956_p8 = por %p955_p7, %p954_p6 }
  0x32   :  { %p957_p9 = pnand %p956_p8, %p950_p5 }
  0x34   :  { %960 = shalt.err (!%p957_p9)
}
  0x35   :  { %30 = dma.hbm_to_vmem [thread:$0]  %s1252_s0, 256, %s25_s15, [#allocation3], %s1061_s21, %s1061_s21, %s1062_s22  }
  0x36   :  { %s961_s30 = scalar_lea.hbm %s1254_s2, 1024 }
  0x37   :  { %p962_p10 = scmp.ne.s32.totalorder %s1254_s2, %s961_s30  ;;  %p965_p11 = scmp.lt.u32.totalorder %s961_s30, %s1254_s2 }
  0x39   :  { %p967_p12 = pnand %p965_p11, %p962_p10 }
  0x3b   :  { %970 = shalt.err (!%p967_p12)
}
  0x3c   :  { %s971_s14 = scalar_lea.vmem %s1157_s17, 1024  ;;  %p976_p0 = scmp.lt.s32.totalorder %s1157_s17, %s1157_s17 }
  0x3d   :  { %p972_p13 = scmp.ne.s32.totalorder %s1157_s17, %s971_s14  ;;  %p977_p1 = scmp.lt.s32.totalorder %s971_s14, %s971_s14 }
  0x3f   :  { %p978_p2 = por %p977_p1, %p976_p0 }
  0x41   :  { %p979_p3 = pnand %p978_p2, %p972_p13 }
  0x43   :  { %982 = shalt.err (!%p979_p3)
}
  0x44   :  { %54 = dma.hbm_to_vmem [thread:$0]  %s1254_s2, 1024, %s1157_s17, [#allocation6], %s1061_s21, %s1061_s21, %s1062_s22  }
  0x45   :  { %s1065_s16 = smov [#allocation10]   ;;  %s1066_s19 = smov [#allocation11]  }
  0x46   :  { %s74_s18 = sshll.u32 %s1065_s16, 4  ;;  %s88_s20 = sshll.u32 %s1066_s19, 4  ;;  %s75_s18 = int_to_ptr.vmem [resolvable:$true] %s74_s18  ;;  %s1194_s20 = int_to_ptr.vmem [resolvable:$true] %s88_s20 }
  0x47   :  { %s983_s25 = scalar_lea.hbm %s1257_s5, 1024 }
  0x48   :  { %p984_p4 = scmp.ne.s32.totalorder %s1257_s5, %s983_s25  ;;  %p987_p5 = scmp.lt.u32.totalorder %s983_s25, %s1257_s5 }
  0x4a   :  { %p989_p6 = pnand %p987_p5, %p984_p4 }
  0x4c   :  { %992 = shalt.err (!%p989_p6)
}
  0x4d   :  { %s993_s2 = scalar_lea.vmem %s75_s18, 1024  ;;  %p998_p8 = scmp.lt.s32.totalorder %s75_s18, %s75_s18 }
  0x4e   :  { %p994_p7 = scmp.ne.s32.totalorder %s75_s18, %s993_s2  ;;  %p999_p9 = scmp.lt.s32.totalorder %s993_s2, %s993_s2 }
  0x50   :  { %p1000_p10 = por %p999_p9, %p998_p8 }
  0x52   :  { %p1001_p11 = pnand %p1000_p10, %p994_p7 }
  0x54   :  { %1004 = shalt.err (!%p1001_p11)
}
  0x55   :  { %80 = dma.hbm_to_vmem [thread:$0]  %s1257_s5, 1024, %s75_s18, [#allocation9], %s1061_s21, %s1061_s21, %s1062_s22  }
  0x56   :  { %s1005_s11 = scalar_lea.hbm %s1259_s7, 1024 }
  0x57   :  { %p1006_p12 = scmp.ne.s32.totalorder %s1259_s7, %s1005_s11  ;;  %p1009_p13 = scmp.lt.u32.totalorder %s1005_s11, %s1259_s7 }
  0x59   :  { %p1011_p0 = pnand %p1009_p13, %p1006_p12 }
  0x5b   :  { %1014 = shalt.err (!%p1011_p0)
}
  0x5c   :  { %s1015_s0 = scalar_lea.vmem %s1194_s20, 1024  ;;  %p1020_p2 = scmp.lt.s32.totalorder %s1194_s20, %s1194_s20 }
  0x5d   :  { %p1016_p1 = scmp.ne.s32.totalorder %s1194_s20, %s1015_s0  ;;  %p1021_p3 = scmp.lt.s32.totalorder %s1015_s0, %s1015_s0 }
  0x5f   :  { %p1022_p4 = por %p1021_p3, %p1020_p2 }
  0x61   :  { %p1023_p5 = pnand %p1022_p4, %p1016_p1 }
  0x63   :  { %1026 = shalt.err (!%p1023_p5)
}
  0x64   :  { %94 = dma.hbm_to_vmem [thread:$0]  %s1259_s7, 1024, %s1194_s20, [#allocation12], %s1061_s21, %s1061_s21, %s1062_s22  }
  0x65   :  { %1049 = dma.done.wait [#allocation3], 256  }
  0x66   :  { %1050 = vsyncadd [#allocation3], 4294967040 }
  0x67   :  { %1051 = dma.done.wait [#allocation6], 1280  }
  0x68   :  { %1052 = vsyncadd [#allocation6], 4294966016 }
  0x69   :  { %1053 = dma.done.wait [#allocation9], 2048  }
  0x6a   :  { %1054 = vsyncadd [#allocation9], 4294965248 }
  0x6b   :  { %1055 = dma.done.wait [#allocation12], 1024  }
  0x6c   :  { %1056 = vsyncadd [#allocation12], 4294966272  ;;  %v851_v0 = vld [vmem:[#allocation7] sm:$0xff]   ;;  %v852_v1 = vld [vmem:[#allocation7 + $0x8] sm:$0xff]   ;;  %s1067_s18 = smov [#allocation13]  }
  0x6d   :  { %756 = vmatprep.subr.bf16.mxu0 %v851_v0  ;;  %v853_v2 = vld [vmem:[#allocation7 + $0x10] sm:$0xff]   ;;  %v854_v3 = vld [vmem:[#allocation7 + $0x18] sm:$0xff]   ;;  %v859_v4 = vld [vmem:[#allocation2] sm:$0xff]   ;;  %s658_s19 = sshll.u32 %s1067_s18, 4  ;;  %s659_s19 = int_to_ptr.vmem [resolvable:$true] %s658_s19 }
  0x6e   :  { %757 = vmatpush3.bf16.msra.mxu0 %v851_v0  ;;  %772 = vmatprep.mubr.bf16.mxu0 %v859_v4  ;;  %v861_v5 = vld [vmem:[#allocation10] sm:$0xff]   ;;  %v862_v6 = vld [vmem:[#allocation10 + $0x8] sm:$0xff]   ;;  %v863_v8 = vld [vmem:[#allocation10 + $0x10] sm:$0xff]   ;;  %s1027_s20 = scalar_lea.vmem %s659_s19, 512  ;;  %p1032_p7 = scmp.lt.s32.totalorder %s659_s19, %s659_s19 }
  0x6f   :  { %758 = vmatprep.subr.bf16.mxu0 %v852_v1  ;;  %v855_v7 = vld [vmem:[#allocation7 + $0x20] sm:$0xff]   ;;  %776 = vmatprep.subr.bf16.mxu1 %v861_v5  ;;  %v856_v9 = vld [vmem:[#allocation7 + $0x28] sm:$0xff]   ;;  %v864_v10 = vld [vmem:[#allocation10 + $0x18] sm:$0xff]   ;;  %p1028_p6 = scmp.ne.s32.totalorder %s659_s19, %s1027_s20  ;;  %p1033_p8 = scmp.lt.s32.totalorder %s1027_s20, %s1027_s20 }
  0x70   :  { %777 = vmatpush3.bf16.msra.mxu1 %v861_v5  ;;  %v857_v11 = vld [vmem:[#allocation7 + $0x30] sm:$0xff]   ;;  %v865_v12 = vld [vmem:[#allocation10 + $0x20] sm:$0xff]   ;;  %v858_v13 = vld [vmem:[#allocation7 + $0x38] sm:$0xff]  }
  0x71   :  { %778 = vmatprep.subr.bf16.mxu1 %v862_v6  ;;  %v866_v14 = vld [vmem:[#allocation10 + $0x28] sm:$0xff]   ;;  %v867_v16 = vld [vmem:[#allocation10 + $0x30] sm:$0xff]   ;;  %v868_v17 = vld [vmem:[#allocation10 + $0x38] sm:$0xff]   ;;  %p1034_p9 = por %p1033_p8, %p1032_p7 }
  0x72   :  { %759 = vmatpush3.bf16.msra.mxu0 %v852_v1  ;;  %v860_v15 = vld [vmem:[#allocation2 + $0x8] sm:$0xff]   ;;  %v869_v18 = vld [vmem:[#allocation8] sm:$0xff]   ;;  %v877_v32 = vld [vmem:[#allocation5] sm:$0xff]  }
  0x73   :  { %760 = vmatprep.subr.bf16.mxu0 %v853_v2  ;;  %v879_v19 = vld [vmem:[#allocation11] sm:$0xff]   ;;  %v880_v20 = vld [vmem:[#allocation11 + $0x8] sm:$0xff]   ;;  %v871_v34 = vld [vmem:[#allocation8 + $0x10] sm:$0xff]   ;;  %p1035_p10 = pnand %p1034_p9, %p1028_p6 }
  0x74   :  { %779 = vmatpush3.bf16.msra.mxu1 %v862_v6  ;;  %v673_v22 = vld [vmem:[%s1255_s3] ss:$0 sm:$0xff]  ;;  %v870_v33 = vld [vmem:[#allocation8 + $0x8] sm:$0xff]   ;;  %v872_v35 = vld [vmem:[#allocation8 + $0x18] sm:$0xff]  }
  0x75   :  { %780 = vmatprep.subr.bf16.mxu1 %v863_v8  ;;  %v873_v36 = vld [vmem:[#allocation8 + $0x20] sm:$0xff]   ;;  %v874_v37 = vld [vmem:[#allocation8 + $0x28] sm:$0xff]   ;;  %v875_v38 = vld [vmem:[#allocation8 + $0x30] sm:$0xff]  }
  0x76   :  { %761 = vmatpush3.bf16.msra.mxu0 %v853_v2  ;;  %v876_v39 = vld [vmem:[#allocation8 + $0x38] sm:$0xff]   ;;  %v881_v41 = vld [vmem:[#allocation11 + $0x10] sm:$0xff]   ;;  %v883_v43 = vld [vmem:[#allocation11 + $0x20] sm:$0xff]  }
  0x77   :  { %762 = vmatprep.subr.bf16.mxu0 %v854_v3  ;;  %v878_v40 = vld [vmem:[#allocation5 + $0x8] sm:$0xff]   ;;  %v884_v44 = vld [vmem:[#allocation11 + $0x28] sm:$0xff]   ;;  %v885_v45 = vld [vmem:[#allocation11 + $0x30] sm:$0xff]  }
  0x78   :  { %781 = vmatpush3.bf16.msra.mxu1 %v863_v8  ;;  %v882_v42 = vld [vmem:[#allocation11 + $0x18] sm:$0xff]   ;;  %v702_v47 = vld [vmem:[%s1258_s6] ss:$0 sm:$0xff] }
  0x79   :  { %782 = vmatprep.subr.bf16.mxu1 %v864_v10  ;;  %v886_v46 = vld [vmem:[#allocation11 + $0x38] sm:$0xff]  }
  0x7a   :  { %763 = vmatpush3.bf16.msra.mxu0 %v854_v3 }
  0x7b   :  { %764 = vmatprep.subr.bf16.mxu0 %v855_v7 }
  0x7c   :  { %783 = vmatpush3.bf16.msra.mxu1 %v864_v10  ;;  %v707_v10 = vld [vmem:[%s1260_s8] ss:$0 sm:$0xff] }
  0x7d   :  { %784 = vmatprep.subr.bf16.mxu1 %v865_v12 }
  0x7e   :  { %765 = vmatpush3.bf16.msra.mxu0 %v855_v7 }
  0x7f   :  { %766 = vmatprep.subr.bf16.mxu0 %v856_v9 }
  0x80   :  { %785 = vmatpush3.bf16.msra.mxu1 %v865_v12 }
  0x81   :  { %786 = vmatprep.subr.bf16.mxu1 %v866_v14 }
  0x82   :  { %767 = vmatpush3.bf16.msra.mxu0 %v856_v9 }
  0x83   :  { %768 = vmatprep.subr.bf16.mxu0 %v857_v11 }
  0x84   :  { %787 = vmatpush3.bf16.msra.mxu1 %v866_v14 }
  0x85   :  { %788 = vmatprep.subr.bf16.mxu1 %v867_v16 }
  0x86   :  { %769 = vmatpush3.bf16.msra.mxu0 %v857_v11 }
  0x87   :  { %770 = vmatprep.subr.bf16.mxu0 %v858_v13 }
  0x88   :  { %789 = vmatpush3.bf16.msra.mxu1 %v867_v16 }
  0x89   :  { %790 = vmatprep.subr.bf16.mxu1 %v868_v17 }
  0x8a   :  { %771 = vmatpush3.bf16.msra.mxu0 %v858_v13 }
  0x8b   :  { %816 = vmatprep.subr.bf16.mxu0 %v879_v19 }
  0x8c   :  { %791 = vmatpush3.bf16.msra.mxu1 %v868_v17 }
  0x8d   :  { %773 = vmatmul.mubr.bf16.vlgmr.msra.gmra.mrb[0].mxu0 %v860_v15  ;;  %796 = vmatprep.subr.bf16.mxu1 %v869_v18 }
  0x8e   :  { %817 = vmatpush3.bf16.msra.mxu0 %v879_v19 }
  0x8f   :  { %818 = vmatprep.subr.bf16.mxu0 %v880_v20 }
  0x92   :  { %819 = vmatpush3.bf16.msra.mxu0 %v880_v20 }
  0x93   :  { %820 = vmatprep.subr.bf16.mxu0 %v881_v41 }
  0x96   :  { %821 = vmatpush3.bf16.msra.mxu0 %v881_v41 }
  0x97   :  { %822 = vmatprep.subr.bf16.mxu0 %v882_v42 }
  0x9a   :  { %823 = vmatpush3.bf16.msra.mxu0 %v882_v42 }
  0x9b   :  { %824 = vmatprep.subr.bf16.mxu0 %v883_v43 }
  0x9e   :  { %825 = vmatpush3.bf16.msra.mxu0 %v883_v43 }
  0x9f   :  { %826 = vmatprep.subr.bf16.mxu0 %v884_v44 }
  0xa2   :  { %827 = vmatpush3.bf16.msra.mxu0 %v884_v44 }
  0xa3   :  { %828 = vmatprep.subr.bf16.mxu0 %v885_v45 }
  0xa6   :  { %829 = vmatpush3.bf16.msra.mxu0 %v885_v45 }
  0xa7   :  { %830 = vmatprep.subr.bf16.mxu0 %v886_v46 }
  0xaa   :  { %831 = vmatpush3.bf16.msra.mxu0 %v886_v46 }
 0x160   :  { %v774_v21 = vpop.f32.mrb[0].mxu0 }
 0x161   :  { %v237_v23 = vpop.f32.mrb[1].mxu0  ;;  %v246_v25 = vadd.f32 %v774_v21, %v673_v22 }
 0x162   :  { %v775_v24 = vpop.f32.mrb[2].mxu0  ;;  %v238_v28 = vadd.f32 %v673_v22, %v237_v23 }
 0x163   :  { %v249_v26 = vadd.f32 %v775_v24, %v673_v22  ;;  %v240_v27 = vpop.f32.mrb[3].mxu0 }
 0x164   :  { %v241_v29 = vadd.f32 %v673_v22, %v240_v27 }
 0x165   :  { %v273_v30 = vpack.c.bf16 %v249_v26, %v246_v25 }
 0x166   :  { %v272_v31 = vpack.c.bf16 %v241_v29, %v238_v28 }
 0x168   :  { %792 = vmatprep.mubr.bf16.mxu1 %v272_v31 }
 0x169   :  { %793 = vmatmul.mubr.bf16.vlgmr.msra.gmra.mrb[0].mxu1 %v273_v30 }
 0x16a   :  { %797 = vmatpush3.bf16.msra.mxu1 %v869_v18  ;;  %812 = vmatprep.mubr.bf16.mxu1 %v877_v32 }
 0x16b   :  { %798 = vmatprep.subr.bf16.mxu1 %v870_v33 }
 0x16e   :  { %799 = vmatpush3.bf16.msra.mxu1 %v870_v33 }
 0x16f   :  { %800 = vmatprep.subr.bf16.mxu1 %v871_v34 }
 0x172   :  { %801 = vmatpush3.bf16.msra.mxu1 %v871_v34 }
 0x173   :  { %802 = vmatprep.subr.bf16.mxu1 %v872_v35 }
 0x176   :  { %803 = vmatpush3.bf16.msra.mxu1 %v872_v35 }
 0x177   :  { %804 = vmatprep.subr.bf16.mxu1 %v873_v36 }
 0x17a   :  { %805 = vmatpush3.bf16.msra.mxu1 %v873_v36 }
 0x17b   :  { %806 = vmatprep.subr.bf16.mxu1 %v874_v37 }
 0x17e   :  { %807 = vmatpush3.bf16.msra.mxu1 %v874_v37 }
 0x17f   :  { %808 = vmatprep.subr.bf16.mxu1 %v875_v38 }
 0x182   :  { %809 = vmatpush3.bf16.msra.mxu1 %v875_v38 }
 0x183   :  { %810 = vmatprep.subr.bf16.mxu1 %v876_v39 }
 0x186   :  { %811 = vmatpush3.bf16.msra.mxu1 %v876_v39 }
 0x189   :  { %813 = vmatmul.mubr.bf16.vlgmr.msra.gmra.mrb[0].mxu1 %v878_v40 }
 0x25c   :  { %v814_v48 = vpop.f32.mrb[0].mxu1 }
 0x25d   :  { %v505_v49 = vadd.f32 %v814_v48, %v702_v47  ;;  %v481_v50 = vpop.f32.mrb[1].mxu1 }
 0x25e   :  { %v503_v51 = vadd.f32 %v702_v47, %v481_v50  ;;  %v815_v52 = vpop.f32.mrb[2].mxu1 }
 0x25f   :  { %v515_v53 = vmul.f32 1.442695, %v505_v49  ;;  %v506_v54 = vadd.f32 %v815_v52, %v702_v47  ;;  %v484_v55 = vpop.f32.mrb[3].mxu1  ;;  %vm509_vm0 = vcmp.gt.f32.partialorder %v505_v49, 0.0 }
 0x260   :  { %v511_v56 = vmul.f32 1.442695, %v503_v51  ;;  %v504_v57 = vadd.f32 %v702_v47, %v484_v55  ;;  %vm507_vm2 = vcmp.gt.f32.partialorder %v503_v51, 0.0 }
 0x261   :  { %887 = vpow2.f32 %v515_v53  ;;  %v517_v58 = vmul.f32 1.442695, %v506_v54  ;;  %vm510_vm1 = vcmp.gt.f32.partialorder %v506_v54, 0.0 }
 0x262   :  { %889 = vpow2.f32 %v511_v56  ;;  %v513_v59 = vmul.f32 1.442695, %v504_v57  ;;  %vm508_vm3 = vcmp.gt.f32.partialorder %v504_v57, 0.0 }
 0x263   :  { %891 = vpow2.f32 %v517_v58 }
 0x264   :  { %893 = vpow2.f32 %v513_v59 }
 0x26b   :  { %v888_v60 = vpop.eup %887 }
 0x26c   :  { %v890_v61 = vpop.eup %889  ;;  %v705_v62 = vadd.f32 -1.0, %v888_v60 }
 0x26d   :  { %v892_v63 = vpop.eup %891  ;;  %v703_v0 = vadd.f32 -1.0, %v890_v61 }
 0x26e   :  { %v894_v1 = vpop.eup %893  ;;  %v706_v2 = vadd.f32 -1.0, %v892_v63  ;;  %v525_v4 = vsel %vm509_vm0, %v505_v49, %v705_v62 }
 0x26f   :  { %v704_v3 = vadd.f32 -1.0, %v894_v1  ;;  %v523_v7 = vsel %vm507_vm2, %v503_v51, %v703_v0 }
 0x270   :  { %v526_v5 = vsel %vm510_vm1, %v506_v54, %v706_v2 }
 0x271   :  { %v528_v6 = vpack.c.bf16 %v526_v5, %v525_v4  ;;  %v524_v8 = vsel %vm508_vm3, %v504_v57, %v704_v3 }
 0x272   :  { %v527_v9 = vpack.c.bf16 %v524_v8, %v523_v7 }
 0x274   :  { %832 = vmatprep.mubr.bf16.mxu0 %v527_v9 }
 0x275   :  { %833 = vmatmul.mubr.bf16.vlgmr.msra.gmra.mrb[4].mxu0 %v528_v6 }
 0x348   :  { %v834_v11 = vpop.f32.mrb[4].mxu0 }
 0x349   :  { %v643_v12 = vadd.f32 %v834_v11, %v707_v10  ;;  %v634_v13 = vpop.f32.mrb[5].mxu0 }
 0x34a   :  { %v635_v14 = vadd.f32 %v707_v10, %v634_v13  ;;  %v835_v15 = vpop.f32.mrb[6].mxu0 }
 0x34b   :  { %651 = vst [vmem:[#allocation13 + $0x10] sm:$0xff] %v643_v12  ;;  %v646_v16 = vadd.f32 %v835_v15, %v707_v10  ;;  %v637_v17 = vpop.f32.mrb[7].mxu0 }
 0x34c   :  { %649 = vst [vmem:[#allocation13] sm:$0xff] %v635_v14  ;;  %v638_v18 = vadd.f32 %v707_v10, %v637_v17 }
 0x34d   :  { %652 = vst [vmem:[#allocation13 + $0x18] sm:$0xff] %v646_v16 }
 0x34e   :  { %650 = vst [vmem:[#allocation13 + $0x8] sm:$0xff] %v638_v18 }
 0x34f   :  { %1038 = shalt.err (!%p1035_p10)
}
 0x350   :  { %s1039_s24 = scalar_lea.hbm %s1261_s9, 512 }
 0x351   :  { %p1040_p11 = scmp.ne.s32.totalorder %s1261_s9, %s1039_s24  ;;  %p1043_p12 = scmp.lt.u32.totalorder %s1039_s24, %s1261_s9 }
 0x353   :  { %p1045_p13 = pnand %p1043_p12, %p1040_p11 }
 0x355   :  { %1048 = shalt.err (!%p1045_p13)
}
 0x356   :  { %s1068_s27 = smov 128   ;;  %s1069_s2 = smov 8  }
 0x357   :  { %664 = dma.vmem_to_hbm [thread:$0]  %s659_s19, 512, %s1261_s9, [#allocation4], %s1068_s27, %s1068_s27, %s1069_s2  }
 0x358   :  { %1057 = dma.done.wait [#allocation4], 512  }
 0x359   :  { %1058 = vsyncadd [#allocation4], 4294966784 }
 0x35a   :  { %668 = vsyncpa [#allocation3], 1 }
 0x35b   :  { %669 = vsyncpa [#allocation6], 1 }
 0x35c   :  { %670 = vsyncpa [#allocation9], 1 }
 0x35d   :  { %671 = vsyncpa [#allocation12], 1 }
 0x35e   :  { %672 = vsyncpa [#allocation4], 1 }

</bundles_post_ra>
